<compile_context>
chip_gen: v5e
topology: v5e:2x2
jax: 0.10.0
libtpu: 0.0.40
codegen_flags: <defaults>
</compile_context>

<pallas_src>
import math
from functools import partial

import jax
import jax.numpy as jnp
from jax.experimental import pallas as pl
from jax.experimental.pallas import tpu as pltpu

BN_EPS = 1e-4   # eps passed to BatchNorm1d in the module
LANE = 128      # TPU lane width (last-dim alignment)
SUBLANE = 8     # f32 sublane width (second-to-last-dim alignment)


def _round_up(n, m):
    return ((n + m - 1) // m) * m


def _pad2d(a, rows, cols):
    return jnp.pad(a, ((0, rows - a.shape[0]), (0, cols - a.shape[1])))


def _make_kernel(b, in_n, in8, hid_p, out_n, mm_dtype):
    """Build the kernel with all dims baked in as static constants.

    b      : actual batch size (no padded rows exist -> BN stats are exact)
    in_n   : true input feature count (matmul K for layer 1)
    in8    : row offset of w2 inside the weight slab (multiple of 8)
    hid_p  : hidden size padded to a lane multiple (weight slab columns)
    out_n  : true output feature count (lane-masked but traffic-minimal store)
    """
    inv_b = 1.0 / b

    def kernel(x_ref, w_ref, v_ref, o_ref):
        # ---- unpack the packed parameter buffers (static, tile-aligned views)
        w1 = w_ref[0:in_n, 0:hid_p]                            # (in_n,  hid_p)
        w2 = w_ref[in8:in8 + hid_p, 0:hid_p]                   # (hid_p, hid_p)
        w3 = w_ref[in8 + hid_p:in8 + 2 * hid_p, 0:out_n]       # (hid_p, out_n)

        v = v_ref[...]                                          # (8, wmax) f32
        b1  = v[0:1, 0:hid_p]
        b2  = v[1:2, 0:hid_p]
        g2  = v[2:3, 0:hid_p]
        be2 = v[3:4, 0:hid_p]
        b3  = v[4:5, 0:out_n]
        g3  = v[5:6, 0:out_n]
        be3 = v[6:7, 0:out_n]

        x = x_ref[...].astype(mm_dtype)                         # (b, in_n)

        def batchnorm(h, gamma, beta):
            # Two-pass fused BN: centered temp reused for variance + normalize.
            # No row masking needed: the batch axis carries no padded rows.
            mu = jnp.sum(h, axis=0, keepdims=True) * inv_b
            hc = h - mu
            var = jnp.sum(hc * hc, axis=0, keepdims=True) * inv_b
            return hc * jax.lax.rsqrt(var + BN_EPS) * gamma + beta

        # ---- layer1: Linear + ReLU ---------------------------------------
        h1 = jnp.dot(x, w1, preferred_element_type=jnp.float32) + b1
        h1 = jnp.maximum(h1, 0.0)

        # ---- layer2: Linear + BatchNorm1d (batch stats) + ReLU -----------
        h2 = jnp.dot(h1.astype(mm_dtype), w2,
                     preferred_element_type=jnp.float32) + b2
        h2 = jnp.maximum(batchnorm(h2, g2, be2), 0.0)

        # ---- layer3: Linear + BatchNorm1d (batch stats) + tanh -----------
        h3 = jnp.dot(h2.astype(mm_dtype), w3,
                     preferred_element_type=jnp.float32) + b3
        h3 = batchnorm(h3, g3, be3)

        o_ref[...] = 2.0 * jnp.tanh(h3)

    return kernel


def pack_params(params, input_size, hidden_size, output_size,
                weight_dtype=jnp.float32):
    """Zero-pad weights once and pack into 2 contiguous buffers.

    Layout (rows):  w1 [0 : in8)   -- only input_size rows are real (K of dot1)
                    w2 [in8 : in8 + hid_p)
                    w3 [in8 + hid_p : in8 + 2*hid_p)
    """
    in8 = _round_up(input_size, SUBLANE)
    hid_p = _round_up(hidden_size, LANE)
    out_p = _round_up(output_size, LANE)
    wmax = max(hid_p, out_p)

    # Static unpack slices are free only while they land on (8,128) tile
    # boundaries -- assert so a future size change cannot silently retile.
    assert in8 % SUBLANE == 0
    assert hid_p % SUBLANE == 0 and hid_p % LANE == 0
    assert wmax % LANE == 0

    wpack = jnp.concatenate(
        [_pad2d(params["w1"], in8, wmax),
         _pad2d(params["w2"], hid_p, wmax),
         _pad2d(params["w3"], hid_p, wmax)],
        axis=0).astype(weight_dtype)                      # (in8 + 2*hid_p, wmax)

    rows = [params["b1"], params["b2"], params["g2"], params["be2"],
            params["b3"], params["g3"], params["be3"]]
    vpack = jnp.concatenate([_pad2d(r, 1, wmax) for r in rows], axis=0)
    vpack = _pad2d(vpack, SUBLANE, wmax).astype(jnp.float32)   # (8, wmax)

    return wpack, vpack, (input_size, in8, hid_p, wmax)


@partial(jax.jit, static_argnames=("dims", "output_size"))
def actor_ddpg_forward(x, wpack, vpack, *, dims, output_size):
    """x: (B, input_size) float32. wpack/vpack/dims from pack_params."""
    input_size, in8, hid_p, wmax = dims
    B, F = x.shape
    if F != input_size:
        raise ValueError(f"expected {input_size} input features, got {F}")
    if B < 2:
        # PyTorch BatchNorm1d in training mode raises for batch==1; mirror it.
        raise ValueError("BatchNorm1d in training mode requires batch size >= 2")

    w_bytes = jnp.dtype(wpack.dtype).itemsize
    slab_bytes = (in8 + 2 * hid_p) * wmax * w_bytes + SUBLANE * wmax * 4
    act_bytes = 4 * B * (in8 + 6 * hid_p + 2 * max(output_size, LANE))
    # Default scoped VMEM is 16/32 MiB, not the physical 64/128 MiB; raise it
    # to the real live set (with headroom) but never above v7x's 64 MiB.
    vmem_limit = int(min(max(slab_bytes + act_bytes + (4 << 20), 32 << 20),
                         64 << 20))

    cost = pl.CostEstimate(
        flops=2 * B * hid_p * (input_size + hid_p + output_size),
        transcendentals=B * output_size + 2 * (hid_p + output_size),
        bytes_accessed=B * (input_size + output_size) * 4 + slab_bytes,
    )

    kernel = _make_kernel(B, input_size, in8, hid_p, output_size,
                          jnp.dtype(wpack.dtype))
    vmem = pl.BlockSpec(memory_space=pltpu.MemorySpace.VMEM)

    return pl.pallas_call(
        kernel,
        out_shape=jax.ShapeDtypeStruct((B, output_size), jnp.float32),
        in_specs=[vmem, vmem, vmem],
        out_specs=vmem,
        compiler_params=pltpu.CompilerParams(vmem_limit_bytes=vmem_limit),
        cost_estimate=cost,
    )(x, wpack, vpack)


def init_params(key, input_size, hidden_size, output_size,
                last_layer_weight_init=0.003):
    """Synthetic init mirroring the module's __init__ ranges.

    Linear weights are stored as (in, out) (transpose of PyTorch's (out, in))
    so the kernel computes x @ W directly.
    """
    ks = jax.random.split(key, 6)

    lim1 = math.sqrt(1.0 / input_size)
    w1 = jax.random.uniform(ks[0], (input_size, hidden_size), jnp.float32, -lim1, lim1)
    b1 = jax.random.uniform(ks[1], (1, hidden_size), jnp.float32, -lim1, lim1)

    lim2 = math.sqrt(1.0 / hidden_size)
    w2 = jax.random.uniform(ks[2], (hidden_size, hidden_size), jnp.float32, -lim2, lim2)
    b2 = jax.random.uniform(ks[3], (1, hidden_size), jnp.float32, -lim2, lim2)

    lim3 = last_layer_weight_init
    w3 = jax.random.uniform(ks[4], (hidden_size, output_size), jnp.float32, -lim3, lim3)
    b3 = jax.random.uniform(ks[5], (1, output_size), jnp.float32,
                            -math.sqrt(1.0 / hidden_size), math.sqrt(1.0 / hidden_size))

    # BatchNorm1d affine params: weight=1, bias=0 (PyTorch defaults).
    g2 = jnp.ones((1, hidden_size), jnp.float32)
    be2 = jnp.zeros((1, hidden_size), jnp.float32)
    g3 = jnp.ones((1, output_size), jnp.float32)
    be3 = jnp.zeros((1, output_size), jnp.float32)

    return dict(w1=w1, b1=b1, w2=w2, b2=b2, g2=g2, be2=be2,
                w3=w3, b3=b3, g3=g3, be3=be3)


def _reference_forward(x, p):
    """Pure-JAX (unpadded) reference for sanity checking."""
    h1 = jnp.maximum(x @ p["w1"] + p["b1"], 0.0)
    h2 = h1 @ p["w2"] + p["b2"]
    mu = h2.mean(0, keepdims=True)
    var = ((h2 - mu) ** 2).mean(0, keepdims=True)
    h2 = jnp.maximum((h2 - mu) / jnp.sqrt(var + BN_EPS) * p["g2"] + p["be2"], 0.0)
    h3 = h2 @ p["w3"] + p["b3"]
    mu = h3.mean(0, keepdims=True)
    var = ((h3 - mu) ** 2).mean(0, keepdims=True)
    h3 = (h3 - mu) / jnp.sqrt(var + BN_EPS) * p["g3"] + p["be3"]
    return 2.0 * jnp.tanh(h3)


if __name__ == "__main__":
    key = jax.random.PRNGKey(0)
    k_param, k_state = jax.random.split(key)

    batch = 8            # >1 so batch statistics are meaningful
    input_size = 16
    hidden_size = 32
    output_size = 8

    params = init_params(k_param, input_size, hidden_size, output_size)
    wpack, vpack, dims = pack_params(params, input_size, hidden_size, output_size)
    state = jax.random.normal(k_state, (batch, input_size), jnp.float32)

    out = actor_ddpg_forward(state, wpack, vpack, dims=dims,
                             output_size=output_size)
    out = jax.block_until_ready(out)

    ref = _reference_forward(state, params)
    assert out.shape == (batch, output_size)
    assert jnp.allclose(out, ref, atol=1e-5, rtol=1e-5), "mismatch vs reference"

    print("KERNEL_OK")
</pallas_src>

<mosaic_0001>
module attributes {stable_mosaic.version = 11 : i64} {
  func.func @kernel(%arg0: memref<8x16xf32, #tpu.memory_space<vmem>>, %arg1: memref<272x128xf32, #tpu.memory_space<vmem>>, %arg2: memref<8x128xf32, #tpu.memory_space<vmem>>, %arg3: memref<8x8xf32, #tpu.memory_space<vmem>>) attributes {dimension_semantics = [], scalar_prefetch = 0 : i64, scratch_operands = 0 : i64, tpu.core_type = #tpu.core_type<tc>} {
    %c0 = arith.constant 0 : index
    %c0_0 = arith.constant 0 : index
    %0 = vector.load %arg1[%c0, %c0_0] : memref<272x128xf32, #tpu.memory_space<vmem>>, vector<16x128xf32>
    %c16 = arith.constant 16 : index
    %c0_1 = arith.constant 0 : index
    %1 = vector.load %arg1[%c16, %c0_1] : memref<272x128xf32, #tpu.memory_space<vmem>>, vector<128x128xf32>
    %c144 = arith.constant 144 : index
    %c0_2 = arith.constant 0 : index
    %2 = vector.load %arg1[%c144, %c0_2] : memref<272x128xf32, #tpu.memory_space<vmem>>, vector<128x8xf32>
    %c0_3 = arith.constant 0 : index
    %c0_4 = arith.constant 0 : index
    %3 = vector.load %arg2[%c0_3, %c0_4] : memref<8x128xf32, #tpu.memory_space<vmem>>, vector<8x128xf32>
    %4 = vector.extract_strided_slice %3 {offsets = [0, 0], sizes = [1, 128], strides = [1, 1]} : vector<8x128xf32> to vector<1x128xf32>
    %5 = vector.extract_strided_slice %3 {offsets = [1, 0], sizes = [1, 128], strides = [1, 1]} : vector<8x128xf32> to vector<1x128xf32>
    %6 = vector.extract_strided_slice %3 {offsets = [2, 0], sizes = [1, 128], strides = [1, 1]} : vector<8x128xf32> to vector<1x128xf32>
    %7 = vector.extract_strided_slice %3 {offsets = [3, 0], sizes = [1, 128], strides = [1, 1]} : vector<8x128xf32> to vector<1x128xf32>
    %8 = vector.extract_strided_slice %3 {offsets = [4, 0], sizes = [1, 8], strides = [1, 1]} : vector<8x128xf32> to vector<1x8xf32>
    %9 = vector.extract_strided_slice %3 {offsets = [5, 0], sizes = [1, 8], strides = [1, 1]} : vector<8x128xf32> to vector<1x8xf32>
    %10 = vector.extract_strided_slice %3 {offsets = [6, 0], sizes = [1, 8], strides = [1, 1]} : vector<8x128xf32> to vector<1x8xf32>
    %c0_5 = arith.constant 0 : index
    %c0_6 = arith.constant 0 : index
    %11 = vector.load %arg0[%c0_5, %c0_6] : memref<8x16xf32, #tpu.memory_space<vmem>>, vector<8x16xf32>
    %cst = arith.constant dense<0.000000e+00> : vector<8x128xf32>
    %12 = tpu.matmul %11, %0, %cst {dimension_numbers = #tpu.dot_dimension_numbers<[1], [0], [0], [1], [0, 0, 1, 1], [], []>} : vector<8x16xf32>, vector<16x128xf32>, vector<8x128xf32> -> vector<8x128xf32>
    %13 = vector.broadcast %4 : vector<1x128xf32> to vector<8x128xf32>
    %14 = arith.addf %12, %13 : vector<8x128xf32>
    %cst_7 = arith.constant 0.000000e+00 : f32
    %15 = vector.broadcast %cst_7 : f32 to vector<8x128xf32>
    %16 = arith.maximumf %14, %15 : vector<8x128xf32>
    %cst_8 = arith.constant dense<0.000000e+00> : vector<8x128xf32>
    %17 = tpu.matmul %16, %1, %cst_8 {dimension_numbers = #tpu.dot_dimension_numbers<[1], [0], [0], [1], [0, 0, 1, 1], [], []>} : vector<8x128xf32>, vector<128x128xf32>, vector<8x128xf32> -> vector<8x128xf32>
    %18 = vector.broadcast %5 : vector<1x128xf32> to vector<8x128xf32>
    %19 = arith.addf %17, %18 : vector<8x128xf32>
    %cst_9 = arith.constant dense<0.000000e+00> : vector<128xf32>
    %20 = vector.multi_reduction <add>, %19, %cst_9 [0] : vector<8x128xf32> to vector<128xf32>
    %21 = vector.shape_cast %20 : vector<128xf32> to vector<1x128xf32>
    %cst_10 = arith.constant 1.250000e-01 : f32
    %22 = vector.broadcast %cst_10 : f32 to vector<1x128xf32>
    %23 = arith.mulf %21, %22 : vector<1x128xf32>
    %24 = vector.broadcast %23 : vector<1x128xf32> to vector<8x128xf32>
    %25 = arith.subf %19, %24 : vector<8x128xf32>
    %26 = arith.mulf %25, %25 : vector<8x128xf32>
    %cst_11 = arith.constant dense<0.000000e+00> : vector<128xf32>
    %27 = vector.multi_reduction <add>, %26, %cst_11 [0] : vector<8x128xf32> to vector<128xf32>
    %28 = vector.shape_cast %27 : vector<128xf32> to vector<1x128xf32>
    %cst_12 = arith.constant 1.250000e-01 : f32
    %29 = vector.broadcast %cst_12 : f32 to vector<1x128xf32>
    %30 = arith.mulf %28, %29 : vector<1x128xf32>
    %cst_13 = arith.constant 9.99999974E-5 : f32
    %31 = vector.broadcast %cst_13 : f32 to vector<1x128xf32>
    %32 = arith.addf %30, %31 : vector<1x128xf32>
    %33 = math.rsqrt %32 : vector<1x128xf32>
    %34 = vector.broadcast %33 : vector<1x128xf32> to vector<8x128xf32>
    %35 = arith.mulf %25, %34 : vector<8x128xf32>
    %36 = vector.broadcast %6 : vector<1x128xf32> to vector<8x128xf32>
    %37 = arith.mulf %35, %36 : vector<8x128xf32>
    %38 = vector.broadcast %7 : vector<1x128xf32> to vector<8x128xf32>
    %39 = arith.addf %37, %38 : vector<8x128xf32>
    %cst_14 = arith.constant 0.000000e+00 : f32
    %40 = vector.broadcast %cst_14 : f32 to vector<8x128xf32>
    %41 = arith.maximumf %39, %40 : vector<8x128xf32>
    %cst_15 = arith.constant dense<0.000000e+00> : vector<8x8xf32>
    %42 = tpu.matmul %41, %2, %cst_15 {dimension_numbers = #tpu.dot_dimension_numbers<[1], [0], [0], [1], [0, 0, 1, 1], [], []>} : vector<8x128xf32>, vector<128x8xf32>, vector<8x8xf32> -> vector<8x8xf32>
    %43 = vector.broadcast %8 : vector<1x8xf32> to vector<8x8xf32>
    %44 = arith.addf %42, %43 : vector<8x8xf32>
    %cst_16 = arith.constant dense<0.000000e+00> : vector<8xf32>
    %45 = vector.multi_reduction <add>, %44, %cst_16 [0] : vector<8x8xf32> to vector<8xf32>
    %46 = vector.shape_cast %45 : vector<8xf32> to vector<1x8xf32>
    %cst_17 = arith.constant 1.250000e-01 : f32
    %47 = vector.broadcast %cst_17 : f32 to vector<1x8xf32>
    %48 = arith.mulf %46, %47 : vector<1x8xf32>
    %49 = vector.broadcast %48 : vector<1x8xf32> to vector<8x8xf32>
    %50 = arith.subf %44, %49 : vector<8x8xf32>
    %51 = arith.mulf %50, %50 : vector<8x8xf32>
    %cst_18 = arith.constant dense<0.000000e+00> : vector<8xf32>
    %52 = vector.multi_reduction <add>, %51, %cst_18 [0] : vector<8x8xf32> to vector<8xf32>
    %53 = vector.shape_cast %52 : vector<8xf32> to vector<1x8xf32>
    %cst_19 = arith.constant 1.250000e-01 : f32
    %54 = vector.broadcast %cst_19 : f32 to vector<1x8xf32>
    %55 = arith.mulf %53, %54 : vector<1x8xf32>
    %cst_20 = arith.constant 9.99999974E-5 : f32
    %56 = vector.broadcast %cst_20 : f32 to vector<1x8xf32>
    %57 = arith.addf %55, %56 : vector<1x8xf32>
    %58 = math.rsqrt %57 : vector<1x8xf32>
    %59 = vector.broadcast %58 : vector<1x8xf32> to vector<8x8xf32>
    %60 = arith.mulf %50, %59 : vector<8x8xf32>
    %61 = vector.broadcast %9 : vector<1x8xf32> to vector<8x8xf32>
    %62 = arith.mulf %60, %61 : vector<8x8xf32>
    %63 = vector.broadcast %10 : vector<1x8xf32> to vector<8x8xf32>
    %64 = arith.addf %62, %63 : vector<8x8xf32>
    %65 = math.tanh %64 : vector<8x8xf32>
    %cst_21 = arith.constant 2.000000e+00 : f32
    %66 = vector.broadcast %cst_21 : f32 to vector<8x8xf32>
    %67 = arith.mulf %66, %65 : vector<8x8xf32>
    %c0_22 = arith.constant 0 : index
    %c0_23 = arith.constant 0 : index
    %68 = vector.load %arg3[%c0_22, %c0_23] : memref<8x8xf32, #tpu.memory_space<vmem>>, vector<8x8xf32>
    tpu.vector_store %arg3[%c0_22, %c0_23], %67 {strides = array<i32>} : memref<8x8xf32, #tpu.memory_space<vmem>>, vector<8x8xf32>,
    return
  }
}

</mosaic_0001>

<bundles_post_ra>
// kernel: actor_ddpg_forward.1
= control target key start
LH: loop header
LB: loop body
LE: loop exit
PB: predicated region body
PF: predicated region fallthrough
CT: control target
= control target key end

     0   :  { %8 = vsyncpa [#allocation3], 0  ;;  %s416_s0 = inlined_call_operand.hbm [shape: f32[8,16], index: 0, kind: input, shape index: {}]   ;;  %s417_s1 = inlined_call_operand.hbm [shape: f32[272,128], index: 1, kind: input, shape index: {}]   ;;  %s418_s2 = inlined_call_operand.hbm [shape: f32[8,128], index: 2, kind: input, shape index: {}]   ;;  %s419_s3 = inlined_call_operand.hbm [shape: f32[8,8], index: 3, kind: output, shape index: {}]  }
   0x1   :  { %9 = vsyncpa [#allocation6], 0  ;;  %s26_s14 = sshll.u32 %s417_s1, 4  ;;  %s27_s14 = int_to_ptr.hbm [resolvable:$true] %s26_s14 }
   0x2   :  { %10 = vsyncpa [#allocation4], 0  ;;  %s366_s15 = smov [#allocation5]   ;;  %s16_s19 = sshll.u32 %s416_s0, 4  ;;  %s17_s19 = int_to_ptr.hbm [resolvable:$true] %s16_s19 }
   0x3   :  { %s28_s16 = sshll.u32 %s366_s15, 4  ;;  %s367_s20 = smov 128   ;;  %s29_s16 = int_to_ptr.vmem [resolvable:$true] %s28_s16 }
   0x4   :  { %s368_s21 = smov 8   ;;  %s369_s22 = smov [#allocation2]  }
   0x5   :  { %34 = dma.hbm_to_vmem [thread:$0]  %s27_s14, 4352, %s29_s16, [#allocation6], %s367_s20, %s367_s20, %s368_s21  }
   0x6   :  { %s18_s23 = sshll.u32 %s369_s22, 4  ;;  %s40_s26 = sshll.u32 %s418_s2, 4  ;;  %s19_s23 = int_to_ptr.vmem [resolvable:$true] %s18_s23  ;;  %s41_s26 = int_to_ptr.hbm [resolvable:$true] %s40_s26 }
   0x7   :  { %21 = dma.hbm_to_vmem [thread:$0]  %s17_s19, 128, %s19_s23, [#allocation3]  }
   0x8   :  { %s370_s1 = smov [#allocation7]  }
   0x9   :  { %s42_s27 = sshll.u32 %s370_s1, 4  ;;  %s43_s27 = int_to_ptr.vmem [resolvable:$true] %s42_s27 }
   0xa   :  { %45 = dma.hbm_to_vmem [thread:$0]  %s41_s26, 128, %s43_s27, [#allocation6]  }
   0xb   :  { %360 = dma.done.wait [#allocation3], 128  }
   0xc   :  { %361 = vsyncadd [#allocation3], 4294967168 }
   0xd   :  { %362 = dma.done.wait [#allocation6], 4480  }
   0xe   :  { %363 = vsyncadd [#allocation6], 4294962816  ;;  %v59_v0 = vld [vmem:[#allocation5 + $0x8] sm:$0xff]  ;;  %v58_v1 = vld [vmem:[#allocation5] sm:$0xff]  ;;  %vm95_vm0 = vcmask 130048   ;;  %vm195_vm4 = vcmask 64512  }
   0xf   :  { %113 = vmatpush.msra.mxu0 %v59_v0  ;;  %v93_v2 = vld [vmem:[#allocation2] sm:$0xff]  ;;  %v75_v3 = vld [vmem:[#allocation5 + $0x88] sm:$0xff]  ;;  %v74_v4 = vld [vmem:[#allocation5 + $0x80] sm:$0xff]  ;;  %s371_s0 = smov [#allocation8]   ;;  %s240_s30 = sshll.u32 %s419_s3, 4  ;;  %s241_s30 = int_to_ptr.hbm [resolvable:$true] %s240_s30 }
  0x10   :  { %121 = vmatpush.msra.mxu1 %v75_v3  ;;  %v73_v5 = vld [vmem:[#allocation5 + $0x78] sm:$0xff]  ;;  %v72_v6 = vld [vmem:[#allocation5 + $0x70] sm:$0xff]  ;;  %v71_v7 = vld [vmem:[#allocation5 + $0x68] sm:$0xff]  ;;  %s238_s2 = sshll.u32 %s371_s0, 4  ;;  %s239_s2 = int_to_ptr.vmem [resolvable:$true] %s238_s2 }
  0x11   :  { %114 = vmatpush.msra.mxu0 %v58_v1  ;;  %v70_v8 = vld [vmem:[#allocation5 + $0x60] sm:$0xff]  ;;  %v69_v9 = vld [vmem:[#allocation5 + $0x58] sm:$0xff]  ;;  %v68_v10 = vld [vmem:[#allocation5 + $0x50] sm:$0xff] }
  0x12   :  { %251 = vmatmul.msk.f32.vlgmr.msra.gmra.mxu0 %vm95_vm0, %v93_v2  ;;  %122 = vmatpush.msra.mxu1 %v74_v4  ;;  %v67_v11 = vld [vmem:[#allocation5 + $0x48] sm:$0xff]  ;;  %v66_v12 = vld [vmem:[#allocation5 + $0x40] sm:$0xff]  ;;  %v65_v13 = vld [vmem:[#allocation5 + $0x38] sm:$0xff] }
  0x13   :  { %v64_v14 = vld [vmem:[#allocation5 + $0x30] sm:$0xff]  ;;  %v63_v15 = vld [vmem:[#allocation5 + $0x28] sm:$0xff]  ;;  %v62_v16 = vld [vmem:[#allocation5 + $0x20] sm:$0xff] }
  0x14   :  { %123 = vmatpush.msra.mxu1 %v73_v5  ;;  %v61_v17 = vld [vmem:[#allocation5 + $0x18] sm:$0xff]  ;;  %v60_v18 = vld [vmem:[#allocation5 + $0x10] sm:$0xff]  ;;  %v91_v25 = vld [vmem:[#allocation5 + $0x108] sm:$0xff] }
  0x15   :  { %v401_v19 = vld [vmem:[#allocation7] sm:$0xff]  ;;  %175 = vmatpush.msra.mxu2 %v91_v25  ;;  %v90_v28 = vld [vmem:[#allocation5 + $0x100] sm:$0xff]  ;;  %v89_v30 = vld [vmem:[#allocation5 + $0xf8] sm:$0xff] }
  0x16   :  { %124 = vmatpush.msra.mxu1 %v72_v6  ;;  %v94_v20 = vperm.slane %v401_v19, 0  ;;  %v120_v24 = vperm.slane %v401_v19, 1  ;;  %v88_v32 = vld [vmem:[#allocation5 + $0xf0] sm:$0xff]  ;;  %v87_v33 = vld [vmem:[#allocation5 + $0xe8] sm:$0xff]  ;;  %v86_v35 = vld [vmem:[#allocation5 + $0xe0] sm:$0xff]  ;;  %v169_v2 = vperm.slane %v401_v19, 2 }
  0x17   :  { %176 = vmatpush.msra.mxu2 %v90_v28  ;;  %v85_v37 = vld [vmem:[#allocation5 + $0xd8] sm:$0xff]  ;;  %v84_v39 = vld [vmem:[#allocation5 + $0xd0] sm:$0xff]  ;;  %v83_v41 = vld [vmem:[#allocation5 + $0xc8] sm:$0xff]  ;;  %v171_v5 = vperm.slane %v401_v19, 3 }
  0x18   :  { %125 = vmatpush.msra.mxu1 %v71_v7  ;;  %v82_v43 = vld [vmem:[#allocation5 + $0xc0] sm:$0xff]  ;;  %v81_v45 = vld [vmem:[#allocation5 + $0xb8] sm:$0xff]  ;;  %v80_v47 = vld [vmem:[#allocation5 + $0xb0] sm:$0xff] }
  0x19   :  { %177 = vmatpush.msra.mxu2 %v89_v30  ;;  %v79_v49 = vld [vmem:[#allocation5 + $0xa8] sm:$0xff]  ;;  %v78_v51 = vld [vmem:[#allocation5 + $0xa0] sm:$0xff]  ;;  %v77_v53 = vld [vmem:[#allocation5 + $0x98] sm:$0xff] }
  0x1a   :  { %126 = vmatpush.msra.mxu1 %v70_v8  ;;  %v76_v55 = vld [vmem:[#allocation5 + $0x90] sm:$0xff] }
  0x1b   :  { %178 = vmatpush.msra.mxu2 %v88_v32 }
  0x1c   :  { %127 = vmatpush.msra.mxu1 %v69_v9  ;;  %v174_v9 = vperm.slane %v401_v19, 4 }
  0x1d   :  { %179 = vmatpush.msra.mxu2 %v87_v33 }
  0x1e   :  { %128 = vmatpush.msra.mxu1 %v68_v10 }
  0x1f   :  { %180 = vmatpush.msra.mxu2 %v86_v35 }
  0x20   :  { %129 = vmatpush.msra.mxu1 %v67_v11 }
  0x21   :  { %181 = vmatpush.msra.mxu2 %v85_v37 }
  0x22   :  { %130 = vmatpush.msra.mxu1 %v66_v12 }
  0x23   :  { %182 = vmatpush.msra.mxu2 %v84_v39 }
  0x24   :  { %131 = vmatpush.msra.mxu1 %v65_v13 }
  0x25   :  { %183 = vmatpush.msra.mxu2 %v83_v41  ;;  %v228_v41 = vperm.slane %v401_v19, 6 }
  0x26   :  { %132 = vmatpush.msra.mxu1 %v64_v14 }
  0x27   :  { %184 = vmatpush.msra.mxu2 %v82_v43 }
  0x28   :  { %133 = vmatpush.msra.mxu1 %v63_v15 }
  0x29   :  { %185 = vmatpush.msra.mxu2 %v81_v45 }
  0x2a   :  { %134 = vmatpush.msra.mxu1 %v62_v16 }
  0x2b   :  { %186 = vmatpush.msra.mxu2 %v80_v47 }
  0x2c   :  { %135 = vmatpush.msra.mxu1 %v61_v17 }
  0x2d   :  { %187 = vmatpush.msra.mxu2 %v79_v49 }
  0x2e   :  { %136 = vmatpush.msra.mxu1 %v60_v18 }
  0x2f   :  { %188 = vmatpush.msra.mxu2 %v78_v51 }
  0x31   :  { %189 = vmatpush.msra.mxu2 %v77_v53 }
  0x33   :  { %190 = vmatpush.msra.mxu2 %v76_v55 }
  0x8f   :  { %v116_v21 = vpop.f32.mrf.mxu0 }
  0x90   :  { %v117_v22 = vadd.f32 %v116_v21, %v94_v20 }
  0x92   :  { %v119_v23 = vmax.f32 %v117_v22, 0.0 }
  0x94   :  { %137 = vmatmul.f32.vlgmr.msra.gmra.mxu1 %v119_v23 }
 0x111   :  { %v138_v26 = vpop.f32.mrf.mxu1 }
 0x112   :  { %v139_v27 = vadd.f32 %v138_v26, %v120_v24 }
 0x114   :  { %v141_v29 = vrot.slane %v139_v27, 4 }
 0x116   :  { %v142_v31 = vadd.f32 %v141_v29, %v139_v27 }
 0x118   :  { %v143_v34 = vrot.slane %v142_v31, 2 }
 0x11a   :  { %v144_v36 = vadd.f32 %v143_v34, %v142_v31 }
 0x11c   :  { %v145_v38 = vrot.slane %v144_v36, 1 }
 0x11e   :  { %v146_v40 = vadd.f32 %v145_v38, %v144_v36  ;;  %v226_v38 = vperm.slane %v401_v19, 5 }
 0x120   :  { %v147_v42 = vmul.f32 0.125, %v146_v40 }
 0x122   :  { %v148_v44 = vsub.f32 %v139_v27, %v147_v42 }
 0x124   :  { %v149_v46 = vmul.f32 %v148_v44, %v148_v44 }
 0x126   :  { %v150_v48 = vrot.slane %v149_v46, 4 }
 0x128   :  { %v151_v50 = vadd.f32 %v150_v48, %v149_v46 }
 0x12a   :  { %v152_v52 = vrot.slane %v151_v50, 2 }
 0x12c   :  { %v153_v54 = vadd.f32 %v152_v52, %v151_v50 }
 0x12e   :  { %v154_v56 = vrot.slane %v153_v54, 1 }
 0x130   :  { %v155_v57 = vadd.f32 %v154_v56, %v153_v54 }
 0x132   :  { %v156_v58 = vmul.f32 0.125, %v155_v57 }
 0x134   :  { %v157_v59 = vadd.f32 0.0001, %v156_v58 }
 0x136   :  { %258 = vrsqrt.f32 %v157_v59  ;;  %vm164_vm2 = vweird.f32 %v157_v59 }
 0x13c   :  { %v259_v60 = vpop.eup %258 }
 0x13d   :  { %v159_v61 = vmul.f32 %v259_v60, %v157_v59  ;;  %vm165_vm1 = vweird.f32 %v259_v60 }
 0x13e   :  { %vm166_vm3 = vmor %vm164_vm2, %vm165_vm1 }
 0x13f   :  { %v160_v62 = vmul.f32 %v259_v60, %v159_v61 }
 0x141   :  { %v161_v63 = vmul.f32 0.5, %v160_v62 }
 0x143   :  { %v162_v0 = vsub.f32 1.5, %v161_v63 }
 0x145   :  { %v163_v1 = vmul.f32 %v259_v60, %v162_v0 }
 0x147   :  { %v167_v3 = vsel %vm166_vm3, %v259_v60, %v163_v1 }
 0x148   :  { %v168_v4 = vmul.f32 %v167_v3, %v148_v44 }
 0x14a   :  { %v170_v6 = vmul.f32 %v169_v2, %v168_v4 }
 0x14c   :  { %v172_v7 = vadd.f32 %v171_v5, %v170_v6 }
 0x14e   :  { %v173_v8 = vmax.f32 %v172_v7, 0.0 }
 0x150   :  { %191 = vmatmul.f32.vlgmr.msra.gmra.mxu2 %v173_v8 }
 0x1d3   :  { %v192_v10 = vpop.f32.mrf.mxu2 }
 0x1d4   :  { %v193_v11 = vadd.f32 %v192_v10, %v174_v9 }
 0x1d6   :  { %v196_v12 = vsel %vm195_vm4, %v193_v11, 0.0 }
 0x1d7   :  { %v197_v13 = vrot.slane %v196_v12, 4 }
 0x1d9   :  { %v198_v14 = vadd.f32 %v197_v13, %v196_v12 }
 0x1db   :  { %v199_v15 = vrot.slane %v198_v14, 2 }
 0x1dd   :  { %v200_v16 = vadd.f32 %v199_v15, %v198_v14 }
 0x1df   :  { %v201_v17 = vrot.slane %v200_v16, 1 }
 0x1e1   :  { %v202_v18 = vadd.f32 %v201_v17, %v200_v16 }
 0x1e3   :  { %v203_v20 = vmul.f32 0.125, %v202_v18 }
 0x1e5   :  { %v204_v21 = vsub.f32 %v193_v11, %v203_v20 }
 0x1e7   :  { %v205_v22 = vmul.f32 %v204_v21, %v204_v21 }
 0x1e9   :  { %v206_v23 = vsel %vm195_vm4, %v205_v22, 0.0 }
 0x1ea   :  { %v207_v24 = vrot.slane %v206_v23, 4 }
 0x1ec   :  { %v208_v25 = vadd.f32 %v207_v24, %v206_v23 }
 0x1ee   :  { %v209_v26 = vrot.slane %v208_v25, 2 }
 0x1f0   :  { %v210_v27 = vadd.f32 %v209_v26, %v208_v25 }
 0x1f2   :  { %v211_v28 = vrot.slane %v210_v27, 1 }
 0x1f4   :  { %v212_v29 = vadd.f32 %v211_v28, %v210_v27 }
 0x1f6   :  { %v213_v30 = vmul.f32 0.125, %v212_v29 }
 0x1f8   :  { %v214_v31 = vadd.f32 0.0001, %v213_v30 }
 0x1fa   :  { %260 = vrsqrt.f32 %v214_v31  ;;  %vm221_vm6 = vweird.f32 %v214_v31 }
 0x200   :  { %v261_v32 = vpop.eup %260 }
 0x201   :  { %v216_v33 = vmul.f32 %v261_v32, %v214_v31  ;;  %vm222_vm5 = vweird.f32 %v261_v32 }
 0x202   :  { %vm223_vm7 = vmor %vm221_vm6, %vm222_vm5 }
 0x203   :  { %v217_v34 = vmul.f32 %v261_v32, %v216_v33 }
 0x205   :  { %v218_v35 = vmul.f32 0.5, %v217_v34 }
 0x207   :  { %v219_v36 = vsub.f32 1.5, %v218_v35 }
 0x209   :  { %v220_v37 = vmul.f32 %v261_v32, %v219_v36 }
 0x20b   :  { %v224_v39 = vsel %vm223_vm7, %v261_v32, %v220_v37 }
 0x20c   :  { %v225_v40 = vmul.f32 %v224_v39, %v204_v21 }
 0x20e   :  { %v227_v42 = vmul.f32 %v226_v38, %v225_v40 }
 0x210   :  { %v229_v43 = vadd.f32 %v228_v41, %v227_v42 }
 0x212   :  { %262 = vtanh.f32 %v229_v43 }
 0x218   :  { %v263_v44 = vpop.eup %262 }
 0x219   :  { %v231_v45 = vmul.f32 2.0, %v263_v44 }
 0x21b   :  { %232 = vst.msk [vmem:[#allocation8] sm:$0xff] %vm195_vm4, %v231_v45 }
 0x21c   :  { %243 = dma.vmem_to_hbm [thread:$0]  %s239_s2, 128, %s241_s30, [#allocation4]  }
 0x21d   :  { %364 = dma.done.wait [#allocation4], 128  }
 0x21e   :  { %365 = vsyncadd [#allocation4], 4294967168 }
 0x21f   :  { %248 = vsyncpa [#allocation3], 1 }
 0x220   :  { %249 = vsyncpa [#allocation6], 1 }
 0x221   :  { %250 = vsyncpa [#allocation4], 1 }

</bundles_post_ra>
